<compile_context>
chip_gen: v7x
topology: tpu7x:2x2x1
jax: 0.10.0
libtpu: 0.0.40
codegen_flags: <defaults>
</compile_context>

<pallas_src>
import functools

import jax
import jax.numpy as jnp
from jax import lax
from jax.experimental import pallas as pl
from jax.experimental.pallas import tpu as pltpu

MAX_LENGTH = 20


def _attn_decoder_kernel(
    # inputs
    tok_ref,    # (T,) int32, SMEM    decoder input tokens (teacher forced)
    emb_ref,    # (Voc, 1, H) bf16    embedding table (3-D: rows gathered by a
                #                     dynamic leading-axis index)
    hid0_ref,   # (1, H) f32          initial hidden state
    enc_ref,    # (L, H) bf16         encoder outputs
    we_ref,     # (H, H+L) bf16       [Wc_e | Wa_e]
    wh_ref,     # (H, 3H+L) bf16      [Whr | Whz | Whn | Wa_h]
    wi_ref,     # (H, 3H) bf16        [Wir | Wiz | Win]
    wca_ref,    # (H, H) bf16         Wc_a
    wo_ref,     # (H, V) bf16         W_out^T
    bc_ref,     # (1, H)  f32         attn_combine bias
    ba_ref,     # (1, L)  f32         attn bias
    bh3_ref,    # (1, 3H) f32         GRU hidden bias [r|z|n]
    bi3_ref,    # (1, 3H) f32         GRU input  bias [r|z|n]
    bo_ref,     # (1, V)  f32         out bias
    # outputs
    logp_ref,   # (T, 1, V) f32       per-step log-probs
    attn_ref,   # (T, 1, L) f32       per-step attention weights
    hout_ref,   # (1, H)   f32        final hidden state
    *, H, L, V, T,
):
    f32 = jnp.float32
    bf16 = jnp.bfloat16

    # Step-invariant reassociation: (attn_w @ enc) @ Wc_a == attn_w @ (enc @ Wc_a).
    # Paid once per call instead of one extra dependent M=1 matmul per step.
    enc_ca = jnp.dot(enc_ref[...], wca_ref[...],
                     preferred_element_type=f32).astype(bf16)          # (L, H)

    def step(t, hid):
        tok = tok_ref[t]
        # In-kernel embedding gather (dynamic index on the untiled leading axis).
        emb_bf = emb_ref[tok]                                          # (1, H) bf16
        # TODO(synk): dropout on the embedding omitted (eval-mode identity).
        hid_bf = hid.astype(bf16)

        # Two fused projections of the raw inputs; the hid projection is issued
        # first so its MXU work overlaps the softmax / XLU chain below.
        hid_proj = jnp.dot(hid_bf, wh_ref[...],
                           preferred_element_type=f32)                 # (1, 3H+L)
        emb_proj = jnp.dot(emb_bf, we_ref[...],
                           preferred_element_type=f32)                 # (1, H+L)

        # attention weights = softmax(Linear(cat(emb, hid))) over L
        a_logits = emb_proj[:, H:] + hid_proj[:, 3 * H:] + ba_ref[...]
        a_max = jnp.max(a_logits, axis=-1, keepdims=True)
        a_exp = jnp.exp(a_logits - a_max)
        attn_w = a_exp / jnp.sum(a_exp, axis=-1, keepdims=True)        # (1, L)

        # attn_combine(cat(emb, attn_w @ enc)) then ReLU (enc @ Wc_a pre-folded)
        combined = (emb_proj[:, :H] + bc_ref[...]
                    + jnp.dot(attn_w.astype(bf16), enc_ca,
                              preferred_element_type=f32))             # (1, H)
        x = jnp.maximum(combined, 0.0)

        # single GRU step, PyTorch gate order (r, z, n); all elementwise in f32
        i_gates = jnp.dot(x.astype(bf16), wi_ref[...],
                          preferred_element_type=f32) + bi3_ref[...]   # (1, 3H)
        h_gates = hid_proj[:, :3 * H] + bh3_ref[...]                   # (1, 3H)
        r = jax.nn.sigmoid(i_gates[:, :H] + h_gates[:, :H])
        z = jax.nn.sigmoid(i_gates[:, H:2 * H] + h_gates[:, H:2 * H])
        n = jnp.tanh(i_gates[:, 2 * H:] + r * h_gates[:, 2 * H:])
        h_new = (1.0 - z) * n + z * hid                                # (1, H) f32

        # output projection + log_softmax
        o_logits = jnp.dot(h_new.astype(bf16), wo_ref[...],
                           preferred_element_type=f32) + bo_ref[...]   # (1, V)
        o_max = jnp.max(o_logits, axis=-1, keepdims=True)
        lse = jnp.log(jnp.sum(jnp.exp(o_logits - o_max),
                              axis=-1, keepdims=True)) + o_max

        logp_ref[t] = o_logits - lse
        attn_ref[t] = attn_w
        return h_new

    hout_ref[...] = lax.fori_loop(0, T, step, hid0_ref[...])


class AttnDecoderRNNPallas:
    """JAX/Pallas port of the PyTorch AttnDecoderRNN forward pass (eval mode)."""

    def __init__(self, hidden_size, output_size, dropout_p=0.1,
                 max_length=MAX_LENGTH, *, key):
        self.hidden_size = hidden_size
        self.output_size = output_size
        self.dropout_p = dropout_p          # eval mode: dropout is identity
        self.max_length = max_length
        H, V, L = hidden_size, output_size, max_length
        f32, bf16 = jnp.float32, jnp.bfloat16
        scale = 0.1

        ks = jax.random.split(key, 11)
        # nn.Embedding(V, H)
        emb = scale * jax.random.normal(ks[0], (V, H), f32)
        # nn.Linear(2H, L)  (attn)
        w_attn = scale * jax.random.normal(ks[1], (L, 2 * H), f32)
        b_attn = scale * jax.random.normal(ks[2], (L,), f32)
        # nn.Linear(2H, H)  (attn_combine)
        w_comb = scale * jax.random.normal(ks[3], (H, 2 * H), f32)
        b_comb = scale * jax.random.normal(ks[4], (H,), f32)
        # nn.GRU(H, H): weight_ih_l0 / weight_hh_l0 are (3H, H), gate order r,z,n
        w_ih = scale * jax.random.normal(ks[5], (3 * H, H), f32)
        w_hh = scale * jax.random.normal(ks[6], (3 * H, H), f32)
        b_ih = scale * jax.random.normal(ks[7], (3 * H,), f32)
        b_hh = scale * jax.random.normal(ks[8], (3 * H,), f32)
        # nn.Linear(H, V)  (out)
        w_out = scale * jax.random.normal(ks[9], (V, H), f32)
        b_out = scale * jax.random.normal(ks[10], (V,), f32)

        # f32 originals kept only for the pure-JAX reference used in testing.
        self._ref = dict(emb=emb, w_attn=w_attn, b_attn=b_attn, w_comb=w_comb,
                         b_comb=b_comb, w_ih=w_ih, w_hh=w_hh, b_ih=b_ih,
                         b_hh=b_hh, w_out=w_out, b_out=b_out)

        # ---- fused / transposed weight packing (done once) -------------------
        wa_e, wa_h = jnp.transpose(w_attn[:, :H]), jnp.transpose(w_attn[:, H:])
        wc_e, wc_a = jnp.transpose(w_comb[:, :H]), jnp.transpose(w_comb[:, H:])
        whr, whz, whn = (jnp.transpose(w_hh[i * H:(i + 1) * H]) for i in range(3))
        wir, wiz, win = (jnp.transpose(w_ih[i * H:(i + 1) * H]) for i in range(3))

        # NOTE: at the reference size H=256 every packed column-group offset
        # (H, 2H, 3H) is a multiple of 128 lanes, so in-kernel slices of
        # emb_proj / hid_proj / i_gates are lane-aligned vreg selects.
        self.w_e = jnp.concatenate([wc_e, wa_e], axis=1).astype(bf16)           # (H, H+L)
        self.w_h = jnp.concatenate([whr, whz, whn, wa_h], axis=1).astype(bf16)  # (H, 3H+L)
        self.w_i = jnp.concatenate([wir, wiz, win], axis=1).astype(bf16)        # (H, 3H)
        self.w_ca = wc_a.astype(bf16)                                           # (H, H)
        self.w_o = jnp.transpose(w_out).astype(bf16)                            # (H, V)
        # Embedding rows only ever feed bf16 MXU operands, so the table can be
        # stored bf16.  3-D layout so the kernel gathers a row with a dynamic
        # leading-axis index (no dynamic sublane addressing).
        self.emb3 = emb.astype(bf16).reshape(V, 1, H)

        self.b_c = b_comb.reshape(1, H)
        self.b_a = b_attn.reshape(1, L)
        self.b_h3 = b_hh.reshape(1, 3 * H)
        self.b_i3 = b_ih.reshape(1, 3 * H)
        self.b_o = b_out.reshape(1, V)

    @functools.partial(jax.jit, static_argnums=0)
    def decode(self, tokens, hidden, encoder_outputs):
        """Run T decoder steps inside a single fused kernel (teacher forcing).

        tokens: int32 (T,); hidden: (1,1,H) f32; encoder_outputs: (L,H) f32.
        Returns (log_probs (T,V), hidden (1,1,H), attn_weights (T,L)).
        """
        H, V, L = self.hidden_size, self.output_size, self.max_length
        T = tokens.shape[0]

        hid0 = hidden.reshape(1, H).astype(jnp.float32)
        enc_bf = encoder_outputs.astype(jnp.bfloat16)   # cast once per call

        vmem = pl.BlockSpec(memory_space=pltpu.MemorySpace.VMEM)
        smem = pl.BlockSpec(memory_space=pltpu.MemorySpace.SMEM)
        kernel = functools.partial(_attn_decoder_kernel, H=H, L=L, V=V, T=T)

        logp, attn, h_out = pl.pallas_call(
            kernel,
            out_shape=(
                jax.ShapeDtypeStruct((T, 1, V), jnp.float32),
                jax.ShapeDtypeStruct((T, 1, L), jnp.float32),
                jax.ShapeDtypeStruct((1, H), jnp.float32),
            ),
            in_specs=[smem] + [vmem] * 13,
            out_specs=(vmem, vmem, vmem),
            compiler_params=pltpu.CompilerParams(
                # keep the full fused weight set (W_o especially) VMEM-resident
                vmem_limit_bytes=32 * 1024 * 1024),
        )(tokens.astype(jnp.int32), self.emb3, hid0, enc_bf,
          self.w_e, self.w_h, self.w_i, self.w_ca, self.w_o,
          self.b_c, self.b_a, self.b_h3, self.b_i3, self.b_o)

        return logp.reshape(T, V), h_out.reshape(1, 1, H), attn.reshape(T, L)

    def __call__(self, token, hidden, encoder_outputs):
        """Single-step forward matching the PyTorch module's signature."""
        logp, h_new, attn = self.decode(token.reshape(1), hidden, encoder_outputs)
        return logp, h_new, attn

    # ---- pure-JAX f32 reference (PyTorch math, step by step) ----------------
    def reference_decode(self, tokens, hidden, encoder_outputs):
        p = self._ref
        H = self.hidden_size
        hid = hidden.reshape(1, H)
        logps, attns = [], []
        for t in range(tokens.shape[0]):
            emb = p["emb"][tokens[t]][None, :]
            a_logits = (jnp.concatenate([emb, hid], axis=1) @ p["w_attn"].T
                        + p["b_attn"])
            attn_w = jax.nn.softmax(a_logits, axis=1)
            attn_applied = attn_w @ encoder_outputs
            comb = (jnp.concatenate([emb, attn_applied], axis=1) @ p["w_comb"].T
                    + p["b_comb"])
            x = jnp.maximum(comb, 0.0)
            gi = x @ p["w_ih"].T + p["b_ih"]
            gh = hid @ p["w_hh"].T + p["b_hh"]
            r = jax.nn.sigmoid(gi[:, :H] + gh[:, :H])
            z = jax.nn.sigmoid(gi[:, H:2 * H] + gh[:, H:2 * H])
            n = jnp.tanh(gi[:, 2 * H:] + r * gh[:, 2 * H:])
            hid = (1.0 - z) * n + z * hid
            logits = hid @ p["w_out"].T + p["b_out"]
            logps.append(jax.nn.log_softmax(logits, axis=1))
            attns.append(attn_w)
        return (jnp.concatenate(logps, axis=0), hid.reshape(1, 1, H),
                jnp.concatenate(attns, axis=0))


if __name__ == "__main__":
    HIDDEN = 32     # hidden_size
    OUTPUT = 16     # output_size (vocab)
    MAXLEN = 8      # max_length
    T = 5           # decode steps for the fused multi-step path

    key = jax.random.PRNGKey(0)
    k_model, k_enc, k_tok = jax.random.split(key, 3)

    model = AttnDecoderRNNPallas(HIDDEN, OUTPUT, max_length=MAXLEN, key=k_model)

    hidden0 = jnp.zeros((1, 1, HIDDEN), jnp.float32)               # initHidden()
    encoder_outputs = jax.random.normal(k_enc, (MAXLEN, HIDDEN), jnp.float32)
    tokens = jax.random.randint(k_tok, (T,), 0, OUTPUT, jnp.int32)

    # --- single-step forward (matches the PyTorch module's forward) ----------
    log_probs, new_hidden, attn_w = model(tokens[:1], hidden0, encoder_outputs)
    jax.block_until_ready((log_probs, new_hidden, attn_w))
    assert log_probs.shape == (1, OUTPUT)
    assert new_hidden.shape == (1, 1, HIDDEN)
    assert attn_w.shape == (1, MAXLEN)

    # --- multi-step fused decode (weights VMEM-resident across all T steps) --
    logp_T, hid_T, attn_T = model.decode(tokens, hidden0, encoder_outputs)
    jax.block_until_ready((logp_T, hid_T, attn_T))
    assert logp_T.shape == (T, OUTPUT) and attn_T.shape == (T, MAXLEN)

    # --- numerical check against the pure-JAX f32 reference ------------------
    ref_logp, ref_hid, ref_attn = model.reference_decode(
        tokens, hidden0, encoder_outputs)
    assert float(jnp.max(jnp.abs(logp_T - ref_logp))) < 3e-2
    assert float(jnp.max(jnp.abs(attn_T - ref_attn))) < 3e-2
    assert float(jnp.max(jnp.abs(hid_T - ref_hid))) < 3e-2
    # both softmaxes normalize
    assert float(jnp.max(jnp.abs(jnp.sum(attn_T, axis=-1) - 1.0))) < 1e-3
    assert float(jnp.max(jnp.abs(jnp.sum(jnp.exp(logp_T), axis=-1) - 1.0))) < 1e-3

    print("KERNEL_OK")
</pallas_src>

<mosaic_0001>
module attributes {stable_mosaic.version = 11 : i64} {
  func.func @_attn_decoder_kernel(%arg0: memref<1xi32, #tpu.memory_space<smem>>, %arg1: memref<16x1x32xbf16, #tpu.memory_space<vmem>>, %arg2: memref<1x32xf32, #tpu.memory_space<vmem>>, %arg3: memref<8x32xbf16, #tpu.memory_space<vmem>>, %arg4: memref<32x40xbf16, #tpu.memory_space<vmem>>, %arg5: memref<32x104xbf16, #tpu.memory_space<vmem>>, %arg6: memref<32x96xbf16, #tpu.memory_space<vmem>>, %arg7: memref<32x32xbf16, #tpu.memory_space<vmem>>, %arg8: memref<32x16xbf16, #tpu.memory_space<vmem>>, %arg9: memref<1x32xf32, #tpu.memory_space<vmem>>, %arg10: memref<1x8xf32, #tpu.memory_space<vmem>>, %arg11: memref<1x96xf32, #tpu.memory_space<vmem>>, %arg12: memref<1x96xf32, #tpu.memory_space<vmem>>, %arg13: memref<1x16xf32, #tpu.memory_space<vmem>>, %arg14: memref<1x1x16xf32, #tpu.memory_space<vmem>>, %arg15: memref<1x1x8xf32, #tpu.memory_space<vmem>>, %arg16: memref<1x32xf32, #tpu.memory_space<vmem>>) attributes {dimension_semantics = [], scalar_prefetch = 0 : i64, scratch_operands = 0 : i64, tpu.core_type = #tpu.core_type<tc>} {
    %c0 = arith.constant 0 : index
    %c0_0 = arith.constant 0 : index
    %0 = vector.load %arg3[%c0, %c0_0] : memref<8x32xbf16, #tpu.memory_space<vmem>>, vector<8x32xbf16>
    %c0_1 = arith.constant 0 : index
    %c0_2 = arith.constant 0 : index
    %1 = vector.load %arg7[%c0_1, %c0_2] : memref<32x32xbf16, #tpu.memory_space<vmem>>, vector<32x32xbf16>
    %cst = arith.constant dense<0.000000e+00> : vector<8x32xf32>
    %2 = tpu.matmul %0, %1, %cst {dimension_numbers = #tpu.dot_dimension_numbers<[1], [0], [0], [1], [0, 0, 1, 1], [], []>} : vector<8x32xbf16>, vector<32x32xbf16>, vector<8x32xf32> -> vector<8x32xf32>
    %3 = arith.truncf %2 : vector<8x32xf32> to vector<8x32xbf16>
    %c0_3 = arith.constant 0 : index
    %c0_4 = arith.constant 0 : index
    %4 = vector.load %arg2[%c0_3, %c0_4] : memref<1x32xf32, #tpu.memory_space<vmem>>, vector<1x32xf32>
    %c0_i32 = arith.constant 0 : i32
    %5 = arith.index_cast %c0_i32 : i32 to index
    %6 = memref.load %arg0[%5] : memref<1xi32, #tpu.memory_space<smem>>
    %7 = arith.index_cast %6 : i32 to index
    %c0_5 = arith.constant 0 : index
    %c0_6 = arith.constant 0 : index
    %8 = vector.load %arg1[%7, %c0_5, %c0_6] : memref<16x1x32xbf16, #tpu.memory_space<vmem>>, vector<1x1x32xbf16>
    %9 = vector.shape_cast %8 : vector<1x1x32xbf16> to vector<1x32xbf16>
    %10 = arith.truncf %4 : vector<1x32xf32> to vector<1x32xbf16>
    %c0_7 = arith.constant 0 : index
    %c0_8 = arith.constant 0 : index
    %11 = vector.load %arg5[%c0_7, %c0_8] : memref<32x104xbf16, #tpu.memory_space<vmem>>, vector<32x104xbf16>
    %cst_9 = arith.constant dense<0.000000e+00> : vector<1x104xf32>
    %12 = tpu.matmul %10, %11, %cst_9 {dimension_numbers = #tpu.dot_dimension_numbers<[1], [0], [0], [1], [0, 0, 1, 1], [], []>} : vector<1x32xbf16>, vector<32x104xbf16>, vector<1x104xf32> -> vector<1x104xf32>
    %c0_10 = arith.constant 0 : index
    %c0_11 = arith.constant 0 : index
    %13 = vector.load %arg4[%c0_10, %c0_11] : memref<32x40xbf16, #tpu.memory_space<vmem>>, vector<32x40xbf16>
    %cst_12 = arith.constant dense<0.000000e+00> : vector<1x40xf32>
    %14 = tpu.matmul %9, %13, %cst_12 {dimension_numbers = #tpu.dot_dimension_numbers<[1], [0], [0], [1], [0, 0, 1, 1], [], []>} : vector<1x32xbf16>, vector<32x40xbf16>, vector<1x40xf32> -> vector<1x40xf32>
    %15 = vector.extract_strided_slice %14 {offsets = [0, 32], sizes = [1, 8], strides = [1, 1]} : vector<1x40xf32> to vector<1x8xf32>
    %16 = vector.extract_strided_slice %12 {offsets = [0, 96], sizes = [1, 8], strides = [1, 1]} : vector<1x104xf32> to vector<1x8xf32>
    %17 = arith.addf %15, %16 : vector<1x8xf32>
    %c0_13 = arith.constant 0 : index
    %c0_14 = arith.constant 0 : index
    %18 = vector.load %arg10[%c0_13, %c0_14] : memref<1x8xf32, #tpu.memory_space<vmem>>, vector<1x8xf32>
    %19 = arith.addf %17, %18 : vector<1x8xf32>
    %cst_15 = arith.constant dense<0xFF800000> : vector<1xf32>
    %20 = vector.multi_reduction <maximumf>, %19, %cst_15 [1] : vector<1x8xf32> to vector<1xf32>
    %21 = vector.shape_cast %20 : vector<1xf32> to vector<1x1xf32>
    %22 = vector.broadcast %21 : vector<1x1xf32> to vector<1x8xf32>
    %23 = arith.subf %19, %22 : vector<1x8xf32>
    %24 = math.exp %23 : vector<1x8xf32>
    %cst_16 = arith.constant dense<0.000000e+00> : vector<1xf32>
    %25 = vector.multi_reduction <add>, %24, %cst_16 [1] : vector<1x8xf32> to vector<1xf32>
    %26 = vector.shape_cast %25 : vector<1xf32> to vector<1x1xf32>
    %27 = vector.broadcast %26 : vector<1x1xf32> to vector<1x8xf32>
    %28 = arith.divf %24, %27 : vector<1x8xf32>
    %29 = vector.extract_strided_slice %14 {offsets = [0, 0], sizes = [1, 32], strides = [1, 1]} : vector<1x40xf32> to vector<1x32xf32>
    %c0_17 = arith.constant 0 : index
    %c0_18 = arith.constant 0 : index
    %30 = vector.load %arg9[%c0_17, %c0_18] : memref<1x32xf32, #tpu.memory_space<vmem>>, vector<1x32xf32>
    %31 = arith.addf %29, %30 : vector<1x32xf32>
    %32 = arith.truncf %28 : vector<1x8xf32> to vector<1x8xbf16>
    %cst_19 = arith.constant dense<0.000000e+00> : vector<1x32xf32>
    %33 = tpu.matmul %32, %3, %cst_19 {dimension_numbers = #tpu.dot_dimension_numbers<[1], [0], [0], [1], [0, 0, 1, 1], [], []>} : vector<1x8xbf16>, vector<8x32xbf16>, vector<1x32xf32> -> vector<1x32xf32>
    %34 = arith.addf %31, %33 : vector<1x32xf32>
    %cst_20 = arith.constant 0.000000e+00 : f32
    %35 = vector.broadcast %cst_20 : f32 to vector<1x32xf32>
    %36 = arith.maximumf %34, %35 : vector<1x32xf32>
    %37 = arith.truncf %36 : vector<1x32xf32> to vector<1x32xbf16>
    %c0_21 = arith.constant 0 : index
    %c0_22 = arith.constant 0 : index
    %38 = vector.load %arg6[%c0_21, %c0_22] : memref<32x96xbf16, #tpu.memory_space<vmem>>, vector<32x96xbf16>
    %cst_23 = arith.constant dense<0.000000e+00> : vector<1x96xf32>
    %39 = tpu.matmul %37, %38, %cst_23 {dimension_numbers = #tpu.dot_dimension_numbers<[1], [0], [0], [1], [0, 0, 1, 1], [], []>} : vector<1x32xbf16>, vector<32x96xbf16>, vector<1x96xf32> -> vector<1x96xf32>
    %c0_24 = arith.constant 0 : index
    %c0_25 = arith.constant 0 : index
    %40 = vector.load %arg12[%c0_24, %c0_25] : memref<1x96xf32, #tpu.memory_space<vmem>>, vector<1x96xf32>
    %41 = arith.addf %39, %40 : vector<1x96xf32>
    %42 = vector.extract_strided_slice %12 {offsets = [0, 0], sizes = [1, 96], strides = [1, 1]} : vector<1x104xf32> to vector<1x96xf32>
    %c0_26 = arith.constant 0 : index
    %c0_27 = arith.constant 0 : index
    %43 = vector.load %arg11[%c0_26, %c0_27] : memref<1x96xf32, #tpu.memory_space<vmem>>, vector<1x96xf32>
    %44 = arith.addf %42, %43 : vector<1x96xf32>
    %45 = vector.extract_strided_slice %41 {offsets = [0, 0], sizes = [1, 32], strides = [1, 1]} : vector<1x96xf32> to vector<1x32xf32>
    %46 = vector.extract_strided_slice %44 {offsets = [0, 0], sizes = [1, 32], strides = [1, 1]} : vector<1x96xf32> to vector<1x32xf32>
    %47 = arith.addf %45, %46 : vector<1x32xf32>
    %48 = arith.negf %47 : vector<1x32xf32>
    %49 = math.exp %48 : vector<1x32xf32>
    %cst_28 = arith.constant 1.000000e+00 : f32
    %50 = vector.broadcast %cst_28 : f32 to vector<1x32xf32>
    %51 = arith.addf %50, %49 : vector<1x32xf32>
    %52 = arith.divf %50, %51 : vector<1x32xf32>
    %53 = vector.extract_strided_slice %41 {offsets = [0, 32], sizes = [1, 32], strides = [1, 1]} : vector<1x96xf32> to vector<1x32xf32>
    %54 = vector.extract_strided_slice %44 {offsets = [0, 32], sizes = [1, 32], strides = [1, 1]} : vector<1x96xf32> to vector<1x32xf32>
    %55 = arith.addf %53, %54 : vector<1x32xf32>
    %56 = arith.negf %55 : vector<1x32xf32>
    %57 = math.exp %56 : vector<1x32xf32>
    %cst_29 = arith.constant 1.000000e+00 : f32
    %58 = vector.broadcast %cst_29 : f32 to vector<1x32xf32>
    %59 = arith.addf %58, %57 : vector<1x32xf32>
    %60 = arith.divf %58, %59 : vector<1x32xf32>
    %61 = vector.extract_strided_slice %41 {offsets = [0, 64], sizes = [1, 32], strides = [1, 1]} : vector<1x96xf32> to vector<1x32xf32>
    %62 = vector.extract_strided_slice %44 {offsets = [0, 64], sizes = [1, 32], strides = [1, 1]} : vector<1x96xf32> to vector<1x32xf32>
    %63 = arith.mulf %52, %62 : vector<1x32xf32>
    %64 = arith.addf %61, %63 : vector<1x32xf32>
    %65 = math.tanh %64 : vector<1x32xf32>
    %cst_30 = arith.constant 1.000000e+00 : f32
    %66 = vector.broadcast %cst_30 : f32 to vector<1x32xf32>
    %67 = arith.subf %66, %60 : vector<1x32xf32>
    %68 = arith.mulf %67, %65 : vector<1x32xf32>
    %69 = arith.mulf %60, %4 : vector<1x32xf32>
    %70 = arith.addf %68, %69 : vector<1x32xf32>
    %71 = arith.truncf %70 : vector<1x32xf32> to vector<1x32xbf16>
    %c0_31 = arith.constant 0 : index
    %c0_32 = arith.constant 0 : index
    %72 = vector.load %arg8[%c0_31, %c0_32] : memref<32x16xbf16, #tpu.memory_space<vmem>>, vector<32x16xbf16>
    %cst_33 = arith.constant dense<0.000000e+00> : vector<1x16xf32>
    %73 = tpu.matmul %71, %72, %cst_33 {dimension_numbers = #tpu.dot_dimension_numbers<[1], [0], [0], [1], [0, 0, 1, 1], [], []>} : vector<1x32xbf16>, vector<32x16xbf16>, vector<1x16xf32> -> vector<1x16xf32>
    %c0_34 = arith.constant 0 : index
    %c0_35 = arith.constant 0 : index
    %74 = vector.load %arg13[%c0_34, %c0_35] : memref<1x16xf32, #tpu.memory_space<vmem>>, vector<1x16xf32>
    %75 = arith.addf %73, %74 : vector<1x16xf32>
    %cst_36 = arith.constant dense<0xFF800000> : vector<1xf32>
    %76 = vector.multi_reduction <maximumf>, %75, %cst_36 [1] : vector<1x16xf32> to vector<1xf32>
    %77 = vector.shape_cast %76 : vector<1xf32> to vector<1x1xf32>
    %78 = vector.broadcast %77 : vector<1x1xf32> to vector<1x16xf32>
    %79 = arith.subf %75, %78 : vector<1x16xf32>
    %80 = math.exp %79 : vector<1x16xf32>
    %cst_37 = arith.constant dense<0.000000e+00> : vector<1xf32>
    %81 = vector.multi_reduction <add>, %80, %cst_37 [1] : vector<1x16xf32> to vector<1xf32>
    %82 = vector.shape_cast %81 : vector<1xf32> to vector<1x1xf32>
    %83 = math.log %82 : vector<1x1xf32>
    %84 = arith.addf %83, %77 : vector<1x1xf32>
    %85 = vector.broadcast %84 : vector<1x1xf32> to vector<1x16xf32>
    %86 = arith.subf %75, %85 : vector<1x16xf32>
    %87 = arith.index_cast %c0_i32 : i32 to index
    %c0_38 = arith.constant 0 : index
    %c0_39 = arith.constant 0 : index
    %88 = vector.load %arg14[%87, %c0_38, %c0_39] : memref<1x1x16xf32, #tpu.memory_space<vmem>>, vector<1x1x16xf32>
    %89 = vector.shape_cast %88 : vector<1x1x16xf32> to vector<1x16xf32>
    %90 = vector.shape_cast %86 : vector<1x16xf32> to vector<1x1x16xf32>
    tpu.vector_store %arg14[%87, %c0_38, %c0_39], %90 {strides = array<i32>} : memref<1x1x16xf32, #tpu.memory_space<vmem>>, vector<1x1x16xf32>,
    %91 = arith.index_cast %c0_i32 : i32 to index
    %c0_40 = arith.constant 0 : index
    %c0_41 = arith.constant 0 : index
    %92 = vector.load %arg15[%91, %c0_40, %c0_41] : memref<1x1x8xf32, #tpu.memory_space<vmem>>, vector<1x1x8xf32>
    %93 = vector.shape_cast %92 : vector<1x1x8xf32> to vector<1x8xf32>
    %94 = vector.shape_cast %28 : vector<1x8xf32> to vector<1x1x8xf32>
    tpu.vector_store %arg15[%91, %c0_40, %c0_41], %94 {strides = array<i32>} : memref<1x1x8xf32, #tpu.memory_space<vmem>>, vector<1x1x8xf32>,
    %c1_i32 = arith.constant 1 : i32
    %c0_42 = arith.constant 0 : index
    %c0_43 = arith.constant 0 : index
    %95 = vector.load %arg16[%c0_42, %c0_43] : memref<1x32xf32, #tpu.memory_space<vmem>>, vector<1x32xf32>
    tpu.vector_store %arg16[%c0_42, %c0_43], %70 {strides = array<i32>} : memref<1x32xf32, #tpu.memory_space<vmem>>, vector<1x32xf32>,
    return
  }
}

</mosaic_0001>

<bundles_post_ra>
// kernel: decode.1
= control target key start
LH: loop header
LB: loop body
LE: loop exit
PB: predicated region body
PF: predicated region fallthrough
CT: control target
= control target key end

     0   :  { %s1273_s0 = inlined_call_operand.<no memory space> [shape: s32[1], index: 0, kind: input, shape index: {}]   ;;  %s1274_s1 = inlined_call_operand.hbm [shape: bf16[16,1,32], index: 1, kind: input, shape index: {}]   ;;  %s1275_s2 = inlined_call_operand.vmem [shape: f32[1,32], index: 2, kind: input, shape index: {}]   ;;  %s1276_s3 = inlined_call_operand.vmem [shape: bf16[8,32], index: 3, kind: input, shape index: {}]   ;;  %s1277_s4 = inlined_call_operand.hbm [shape: bf16[32,40], index: 4, kind: input, shape index: {}]   ;;  %s1278_s5 = inlined_call_operand.vmem [shape: bf16[32,104], index: 5, kind: input, shape index: {}]   ;;  %s1279_s6 = inlined_call_operand.vmem [shape: bf16[32,96], index: 6, kind: input, shape index: {}]   ;;  %s1280_s7 = inlined_call_operand.vmem [shape: bf16[32,32], index: 7, kind: input, shape index: {}]   ;;  %s1281_s8 = inlined_call_operand.vmem [shape: bf16[32,16], index: 8, kind: input, shape index: {}]   ;;  %s1282_s9 = inlined_call_operand.hbm [shape: f32[1,32], index: 9, kind: input, shape index: {}]   ;;  %s1283_s10 = inlined_call_operand.hbm [shape: f32[1,8], index: 10, kind: input, shape index: {}]   ;;  %s1284_s11 = inlined_call_operand.hbm [shape: f32[1,96], index: 11, kind: input, shape index: {}]   ;;  %s1285_s12 = inlined_call_operand.hbm [shape: f32[1,96], index: 12, kind: input, shape index: {}]   ;;  %s1286_s13 = inlined_call_operand.vmem [shape: f32[1,16], index: 13, kind: input, shape index: {}]   ;;  %s1287_s14 = inlined_call_operand.hbm [shape: f32[1,1,16], index: 14, kind: output, shape index: {0}]   ;;  %s1288_s15 = inlined_call_operand.hbm [shape: f32[1,1,8], index: 15, kind: output, shape index: {1}]   ;;  %s1289_s16 = inlined_call_operand.hbm [shape: f32[1,32], index: 16, kind: output, shape index: {2}]  }
   0x1   :  { %1291 = sst [smem:[#allocation24_spill]] %s1273_s0 }
   0x2   :  { %1292 = sst [smem:[#allocation25_spill]] %s1287_s14 }
   0x3   :  { %23 = vsyncpa [#allocation4], 0 }
   0x4   :  { %24 = vsyncpa [#allocation7], 0 }
   0x5   :  { %25 = vsyncpa [#allocation10], 0 }
   0x6   :  { %26 = vsyncpa [#allocation13], 0 }
   0x7   :  { %27 = vsyncpa [#allocation5], 0 }
   0x8   :  { %28 = vsyncpa [#allocation16], 0  ;;  %s966_s21 = smov [#allocation6]   ;;  %s756_s25 = scalar_lea.hbm %s1277_s4, 256 }
   0x9   :  { %s52_s22 = sshll.u32 %s966_s21, 4  ;;  %p757_p0 = scmp.ne.s32.totalorder %s1277_s4, %s756_s25  ;;  %s53_s22 = int_to_ptr.vmem [resolvable:$true] %s52_s22 }
   0xa   :  { %p760_p1 = scmp.lt.u32.totalorder %s756_s25, %s1277_s4 }
   0xc   :  { %p762_p2 = pnand %p760_p1, %p757_p0 }
   0xe   :  { %765 = shalt.err (!%p762_p2)
}
   0xf   :  { %s766_s30 = scalar_lea.vmem %s53_s22, 256  ;;  %p771_p4 = scmp.lt.s32.totalorder %s53_s22, %s53_s22 }
  0x10   :  { %p767_p3 = scmp.ne.s32.totalorder %s53_s22, %s766_s30  ;;  %p772_p5 = scmp.lt.s32.totalorder %s766_s30, %s766_s30 }
  0x12   :  { %p773_p6 = por %p772_p5, %p771_p4 }
  0x14   :  { %p774_p7 = pnand %p773_p6, %p767_p3 }
  0x16   :  { %777 = shalt.err (!%p774_p7)
}
  0x17   :  { %s967_s0 = smov 64   ;;  %s968_s17 = smov 4  }
  0x18   :  { %58 = dma.hbm_to_vmem [thread:$0]  %s1277_s4, 256, %s53_s22, [#allocation7], %s967_s0, %s967_s0, %s968_s17  }
  0x19   :  { %s969_s20 = smov [#allocation9]   ;;  %s970_s23 = smov [#allocation3]  }
  0x1a   :  { %s83_s21 = sshll.u32 %s969_s20, 4  ;;  %s36_s24 = sshll.u32 %s970_s23, 4  ;;  %s84_s21 = int_to_ptr.vmem [resolvable:$true] %s83_s21  ;;  %s37_s24 = int_to_ptr.vmem [resolvable:$true] %s36_s24 }
  0x1b   :  { %s778_s27 = scalar_lea.hbm %s1283_s10, 16 }
  0x1c   :  { %p779_p8 = scmp.ne.s32.totalorder %s1283_s10, %s778_s27  ;;  %p782_p9 = scmp.lt.u32.totalorder %s778_s27, %s1283_s10 }
  0x1e   :  { %p784_p10 = pnand %p782_p9, %p779_p8 }
  0x20   :  { %787 = shalt.err (!%p784_p10)
}
  0x21   :  { %s788_s4 = scalar_lea.vmem %s84_s21, 16  ;;  %s792_s22 = scalar_lea.vmem %s84_s21, 32 }
  0x22   :  { %p789_p11 = scmp.ne.s32.totalorder %s84_s21, %s788_s4  ;;  %p793_p12 = scmp.lt.s32.totalorder %s84_s21, %s84_s21 }
  0x23   :  { %p794_p13 = scmp.lt.s32.totalorder %s792_s22, %s788_s4 }
  0x25   :  { %p795_p0 = por %p794_p13, %p793_p12 }
  0x27   :  { %p796_p1 = pnand %p795_p0, %p789_p11 }
  0x29   :  { %799 = shalt.err (!%p796_p1)
}
  0x2a   :  { %86 = dma.hbm_to_vmem [thread:$0]  %s1283_s10, 16, %s84_s21, [#allocation10]  }
  0x2b   :  { %s800_s14 = scalar_lea.hbm %s1274_s1, 256 }
  0x2c   :  { %p801_p2 = scmp.ne.s32.totalorder %s1274_s1, %s800_s14  ;;  %p804_p3 = scmp.lt.u32.totalorder %s800_s14, %s1274_s1 }
  0x2e   :  { %p806_p4 = pnand %p804_p3, %p801_p2 }
  0x30   :  { %809 = shalt.err (!%p806_p4)
}
  0x31   :  { %s810_s28 = scalar_lea.vmem %s37_s24, 256  ;;  %p815_p6 = scmp.lt.s32.totalorder %s37_s24, %s37_s24 }
  0x32   :  { %p811_p5 = scmp.ne.s32.totalorder %s37_s24, %s810_s28  ;;  %p816_p7 = scmp.lt.s32.totalorder %s810_s28, %s810_s28 }
  0x34   :  { %p817_p8 = por %p816_p7, %p815_p6 }
  0x36   :  { %p818_p9 = pnand %p817_p8, %p811_p5 }
  0x38   :  { %821 = shalt.err (!%p818_p9)
}
  0x39   :  { %s971_s10 = smov 16   ;;  %s972_s21 = smov 1  }
  0x3a   :  { %42 = dma.hbm_to_vmem [thread:$0]  %s1274_s1, 256, %s37_s24, [#allocation4], %s971_s10, %s971_s10, %s972_s21  }
  0x3b   :  { %s973_s4 = smov [#allocation8]   ;;  %s974_s17 = smov [#allocation11]  }
  0x3c   :  { %s73_s22 = sshll.u32 %s973_s4, 4  ;;  %s93_s18 = sshll.u32 %s974_s17, 4  ;;  %s74_s22 = int_to_ptr.vmem [resolvable:$true] %s73_s22  ;;  %s94_s18 = int_to_ptr.vmem [resolvable:$true] %s93_s18 }
  0x3d   :  { %s822_s14 = scalar_lea.hbm %s1282_s9, 16 }
  0x3e   :  { %p823_p10 = scmp.ne.s32.totalorder %s1282_s9, %s822_s14  ;;  %p826_p11 = scmp.lt.u32.totalorder %s822_s14, %s1282_s9 }
  0x40   :  { %p828_p12 = pnand %p826_p11, %p823_p10 }
  0x42   :  { %831 = shalt.err (!%p828_p12)
}
  0x43   :  { %s832_s1 = scalar_lea.vmem %s74_s22, 16  ;;  %s836_s24 = scalar_lea.vmem %s74_s22, 32 }
  0x44   :  { %p833_p13 = scmp.ne.s32.totalorder %s74_s22, %s832_s1  ;;  %p837_p0 = scmp.lt.s32.totalorder %s74_s22, %s74_s22 }
  0x45   :  { %p838_p1 = scmp.lt.s32.totalorder %s836_s24, %s832_s1 }
  0x47   :  { %p839_p2 = por %p838_p1, %p837_p0 }
  0x49   :  { %p840_p3 = pnand %p839_p2, %p833_p13 }
  0x4b   :  { %843 = shalt.err (!%p840_p3)
}
  0x4c   :  { %76 = dma.hbm_to_vmem [thread:$0]  %s1282_s9, 16, %s74_s22, [#allocation7]  }
  0x4d   :  { %s844_s30 = scalar_lea.hbm %s1284_s11, 16 }
  0x4e   :  { %p845_p4 = scmp.ne.s32.totalorder %s1284_s11, %s844_s30  ;;  %p848_p5 = scmp.lt.u32.totalorder %s844_s30, %s1284_s11 }
  0x50   :  { %p850_p6 = pnand %p848_p5, %p845_p4 }
  0x52   :  { %853 = shalt.err (!%p850_p6)
}
  0x53   :  { %s854_s14 = scalar_lea.vmem %s94_s18, 16  ;;  %s858_s23 = scalar_lea.vmem %s94_s18, 32 }
  0x54   :  { %p855_p7 = scmp.ne.s32.totalorder %s94_s18, %s854_s14  ;;  %p859_p8 = scmp.lt.s32.totalorder %s94_s18, %s94_s18 }
  0x55   :  { %p860_p9 = scmp.lt.s32.totalorder %s858_s23, %s854_s14 }
  0x57   :  { %p861_p10 = por %p860_p9, %p859_p8 }
  0x59   :  { %p862_p11 = pnand %p861_p10, %p855_p7 }
  0x5b   :  { %865 = shalt.err (!%p862_p11)
}
  0x5c   :  { %96 = dma.hbm_to_vmem [thread:$0]  %s1284_s11, 16, %s94_s18, [#allocation10]  }
  0x5d   :  { %s975_s25 = smov [#allocation12]   ;;  %s866_s24 = scalar_lea.hbm %s1285_s12, 16 }
  0x5e   :  { %s103_s26 = sshll.u32 %s975_s25, 4  ;;  %p867_p12 = scmp.ne.s32.totalorder %s1285_s12, %s866_s24  ;;  %s104_s26 = int_to_ptr.vmem [resolvable:$true] %s103_s26 }
  0x5f   :  { %p870_p13 = scmp.lt.u32.totalorder %s866_s24, %s1285_s12 }
  0x61   :  { %p872_p0 = pnand %p870_p13, %p867_p12 }
  0x63   :  { %875 = shalt.err (!%p872_p0)
}
  0x64   :  { %s876_s30 = scalar_lea.vmem %s104_s26, 16  ;;  %s880_s11 = scalar_lea.vmem %s104_s26, 32 }
  0x65   :  { %p877_p1 = scmp.ne.s32.totalorder %s104_s26, %s876_s30  ;;  %p881_p2 = scmp.lt.s32.totalorder %s104_s26, %s104_s26 }
  0x66   :  { %p882_p3 = scmp.lt.s32.totalorder %s880_s11, %s876_s30 }
  0x68   :  { %p883_p4 = por %p882_p3, %p881_p2 }
  0x6a   :  { %p884_p5 = pnand %p883_p4, %p877_p1 }
  0x6c   :  { %887 = shalt.err (!%p884_p5)
}
  0x6d   :  { %106 = dma.hbm_to_vmem [thread:$0]  %s1285_s12, 16, %s104_s26, [#allocation13]  }
  0x6e   :  { %954 = dma.done.wait [#allocation4], 256  }
  0x6f   :  { %955 = vsyncadd [#allocation4], 4294967040 }
  0x70   :  { %956 = dma.done.wait [#allocation7], 272  }
  0x71   :  { %957 = vsyncadd [#allocation7], 4294967024 }
  0x72   :  { %958 = dma.done.wait [#allocation10], 32  }
  0x73   :  { %959 = vsyncadd [#allocation10], 4294967264 }
  0x74   :  { %960 = dma.done.wait [#allocation13], 16  }
  0x75   :  { %961 = vsyncadd [#allocation13], 4294967280  ;;  %v976_v0 = vmov 0.0   ;;  %vm977_vm0 = vmmov 0   ;;  %v732_v1 = vld [vmem:[%s1278_s5] sm:$0xff]   ;;  %v733_v2 = vld [vmem:[%s1278_s5 + $0x8] sm:$0xff]  }
  0x76   :  { %677 = vmatprep.subr.bf16.mxu1 %v976_v0  ;;  %681 = vmatprep.mubr.msk.bf16.mxu1 %vm977_vm0, %v976_v0  ;;  %v1157_v3 = vld [vmem:[%s1275_s2] sm:$0x1]  ;;  %v735_v6 = vld [vmem:[%s1280_s7 + $0x8] sm:$0xff]   ;;  %vm145_vm1 = vcmask 261120   ;;  %v736_v8 = vld [vmem:[#allocation6] sm:$0xff]   ;;  %s1293_s27 = sld [smem:[#allocation24_spill]] }
  0x77   :  { %669 = vmatprep.subr.bf16.mxu0 %v976_v0  ;;  %673 = vmatprep.mubr.msk.bf16.mxu0 %vm977_vm0, %v976_v0  ;;  %v734_v4 = vld [vmem:[%s1280_s7] sm:$0xff]   ;;  %v194_v5 = vpack.c.bf16 %v1157_v3, %v1157_v3  ;;  %v737_v9 = vld [vmem:[#allocation6 + $0x8] sm:$0xff]   ;;  %vm355_vm2 = vcmask 1043456   ;;  %s978_s24 = smov 32   ;;  %vm328_vm3 = vcmask 319744   ;;  %s979_s28 = smov 96  }
  0x78   :  { %678 = vmatpush3.bf16.msra.mxu1 %v732_v1  ;;  %670 = vmatpush3.bf16.msra.mxu0 %v734_v4  ;;  %v128_v7 = vld [vmem:[%s1276_s3] sm:$0xf]  ;;  %vm339_vm4 = vcmask 57344   ;;  %v462_v42 = vld [vmem:[#allocation11] sm:$0x1]  ;;  %vm351_vm5 = vcmask 64512  }
  0x79   :  { %679 = vmatprep.subr.bf16.mxu1 %v976_v0  ;;  %671 = vmatprep.subr.bf16.mxu0 %v976_v0  ;;  %v643_v14 = vld [vmem:[#allocation9] ss:$0 sm:$0xff]  ;;  %v739_v45 = vld [vmem:[%s1279_s6 + $0x8] sm:$0xff]   ;;  %v345_v46 = vld [vmem:[#allocation8] sm:$0x1]  ;;  %vm562_vm6 = vcmask 122880  }
  0x7a   :  { %v738_v38 = vld [vmem:[%s1279_s6] sm:$0xff]  }
  0x7b   :  { %v406_v55 = vld [vmem:[#allocation12] sm:$0x1] }
  0x7c   :  { %680 = vmatpush3.bf16.msra.mxu1 %v733_v2  ;;  %672 = vmatpush3.bf16.msra.mxu0 %v735_v6  ;;  %s192_s1 = scalar_lea.vmem [#allocation3], %s1293_s27 }
  0x7d   :  { %693 = vmatprep.subr.bf16.mxu1 %v976_v0  ;;  %685 = vmatprep.subr.bf16.mxu0 %v976_v0  ;;  %v193_v10 = vld [vmem:[%s192_s1] sm:$0x1] }
  0x7f   :  { %682 = vmatmul.mubr.msk.bf16.vlgmr.msra.gmra.mrb[0].mxu1 %vm145_vm1, %v194_v5  ;;  %674 = vmatmul.mubr.msk.bf16.vlgmr.msra.gmra.mrb[0].mxu0 %vm145_vm1, %v128_v7 }
  0x80   :  { %695 = vmatprep.mubr.msk.bf16.mxu1 %vm977_vm0, %v976_v0  ;;  %686 = vmatpush3.bf16.msra.mxu0 %v736_v8  ;;  %v489_v8 = vlaneseq }
  0x81   :  { %689 = vmatprep.mubr.msk.bf16.mxu0 %vm977_vm0, %v976_v0  ;;  %687 = vmatprep.subr.bf16.mxu0 %v976_v0 }
  0x84   :  { %688 = vmatpush3.bf16.msra.mxu0 %v737_v9  ;;  %v490_v9 = vshrl.u32 %v489_v8, 7 }
  0x85   :  { %699 = vmatprep.subr.bf16.mxu0 %v976_v0 }
  0x87   :  { %690 = vmatmul.mubr.msk.bf16.vlgmr.msra.gmra.mrb[4].mxu0 %vm145_vm1, %v193_v10  ;;  %v491_v10 = vsub.s32 0, %v490_v9 }
  0x88   :  { %703 = vmatprep.mubr.msk.bf16.mxu0 %vm977_vm0, %v976_v0  ;;  %700 = vmatpush3.bf16.msra.mxu0 %v738_v38 }
  0x89   :  { %701 = vmatprep.subr.bf16.mxu0 %v976_v0 }
  0x8c   :  { %702 = vmatpush3.bf16.msra.mxu0 %v739_v45 }
 0x152   :  { %v248_v11 = vpop.f32.mrb[0].mxu1  ;;  %v183_v16 = vpop.f32.mrb[0].mxu0 }
 0x153   :  { %314 = vrot.lane.b32.xlu0 %v248_v11, %s967_s0  ;;  %v683_v12 = vpop.f32.mrb[1].mxu1  ;;  %v189_v17 = vpack.c.bf16 %v183_v16, %v183_v16  ;;  %v675_v18 = vpop.f32.mrb[1].mxu0  ;;  %v463_v43 = vadd.f32 %v462_v42, %v248_v11  ;;  %v740_v11 = vld [vmem:[%s1281_s8] sm:$0xff]  }
 0x154   :  { %v251_v13 = vpop.f32.mrb[2].mxu1  ;;  %v186_v19 = vpop.f32.mrb[2].mxu0 }
 0x155   :  { %v684_v15 = vpop.f32.mrb[3].mxu1  ;;  %v357_v20 = vsel %vm355_vm2, %v189_v17, 0  ;;  %v676_v21 = vpop.f32.mrb[3].mxu0  ;;  %v741_v13 = vld [vmem:[%s1281_s8 + $0x8] sm:$0xff]  }
 0x156   :  { %694 = vmatpush3.bf16.msra.mxu1 %v357_v20 }
 0x157   :  { %324 = vrot.lane.b32.xlu0 %v643_v14, %s978_s24  ;;  %707 = vmatprep.subr.bf16.mxu1 %v976_v0  ;;  %v492_v14 = vrot.slane %v1157_v3, %v491_v10  ;;  %v503_v3 = vld [vmem:[%s1286_s13] sm:$0x1]  ;;  %s980_s13 = smov [#allocation15]  }
 0x158   :  { %s604_s12 = sshll.u32 %s980_s13, 4  ;;  %s605_s12 = int_to_ptr.vmem [resolvable:$true] %s604_s12 }
 0x159   :  { %s888_s17 = scalar_lea.vmem %s605_s12, 16  ;;  %s892_s19 = scalar_lea.vmem %s605_s12, 32 }
 0x15a   :  { %v307_v22 = vpop.f32.mrb[4].mxu0  ;;  %p889_p6 = scmp.ne.s32.totalorder %s605_s12, %s888_s17  ;;  %p893_p7 = scmp.lt.s32.totalorder %s605_s12, %s605_s12 }
 0x15b   :  { %v691_v23 = vpop.f32.mrb[5].mxu0  ;;  %v346_v47 = vadd.f32 %v345_v46, %v307_v22  ;;  %p894_p8 = scmp.lt.s32.totalorder %s892_s19, %s888_s17 }
 0x15c   :  { %v310_v24 = vpop.f32.mrb[6].mxu0 }
 0x15d   :  { %v692_v25 = vpop.f32.mrb[7].mxu0  ;;  %p895_p9 = por %p894_p8, %p893_p7 }
 0x15f   :  { %p896_p10 = pnand %p895_p9, %p889_p6 }
 0x1c5   :  { %v315_v26 = vpop.permute.xlu0 %314 }
 0x1c6   :  { %v317_v27 = vadd.f32 %v315_v26, %v307_v22 }
 0x1c9   :  { %v325_v28 = vpop.permute.xlu0 %324 }
 0x1ca   :  { %v327_v29 = vadd.f32 %v325_v28, %v317_v27 }
 0x1cc   :  { %v329_v30 = vsel %vm328_vm3, %v327_v29, -inf }
 0x1cd   :  { %330 = vmax.xlane.f32.xlu1 %v329_v30 }
 0x25a   :  { %v331_v31 = vpop.xlane.xlu1 %330 }
 0x25b   :  { %v332_v32 = vsub.f32 %v327_v29, %v331_v31 }
 0x25d   :  { %v333_v33 = vmul.f32 1.442695, %v332_v32 }
 0x25f   :  { %742 = vpow2.f32 %v333_v33 }
 0x269   :  { %v743_v34 = vpop.eup %742 }
 0x26a   :  { %336 = vrot.lane.b32.xlu1 %v743_v34, %s979_s28 }
 0x2dc   :  { %v337_v35 = vpop.permute.xlu1 %336 }
 0x2dd   :  { %v340_v36 = vsel %vm339_vm4, %v337_v35, 0.0 }
 0x2de   :  { %341 = vadd.xlane.f32.xlu0 %v340_v36 }
 0x36b   :  { %v342_v37 = vpop.xlane.xlu0 %341 }
 0x36c   :  { %744 = vrcp.f32 %v342_v37 }
 0x376   :  { %v745_v39 = vpop.eup %744 }
 0x377   :  { %v1197_v40 = vmul.f32 %v745_v39, %v743_v34 }
 0x379   :  { %v347_v41 = vpack.c.bf16 %v1197_v40, %v1197_v40 }
 0x37b   :  { %349 = vrot.lane.b32.xlu1 %v347_v41, %s979_s28 }
 0x37f   :  { %472 = vrot.lane.b32.xlu1 %v463_v43, %s967_s0 }
 0x3ed   :  { %v350_v44 = vpop.permute.xlu1 %349 }
 0x3ee   :  { %696 = vmatmul.mubr.msk.bf16.vlgmr.msra.gmra.mrb[4].mxu1 %vm351_vm5, %v350_v44 }
 0x3ef   :  { %711 = vmatprep.mubr.msk.bf16.mxu1 %vm977_vm0, %v976_v0  ;;  %708 = vmatpush3.bf16.msra.mxu1 %v740_v11 }
 0x3f0   :  { %709 = vmatprep.subr.bf16.mxu1 %v976_v0 }
 0x3f1   :  { %v473_v4 = vpop.permute.xlu1 %472 }
 0x3f3   :  { %710 = vmatpush3.bf16.msra.mxu1 %v741_v13 }
 0x4c1   :  { %v393_v48 = vpop.f32.mrb[4].mxu1 }
 0x4c2   :  { %v399_v49 = vadd.f32 %v393_v48, %v346_v47  ;;  %v697_v50 = vpop.f32.mrb[5].mxu1 }
 0x4c3   :  { %v396_v51 = vpop.f32.mrb[6].mxu1 }
 0x4c4   :  { %v400_v52 = vmax.f32 %v399_v49, 0.0  ;;  %v698_v53 = vpop.f32.mrb[7].mxu1 }
 0x4c6   :  { %v401_v54 = vpack.c.bf16 %v400_v52, %v400_v52 }
 0x4c8   :  { %704 = vmatmul.mubr.msk.bf16.vlgmr.msra.gmra.mrb[8].mxu0 %vm145_vm1, %v401_v54 }
 0x59b   :  { %v456_v56 = vpop.f32.mrb[8].mxu0 }
 0x59c   :  { %v457_v57 = vadd.f32 %v456_v56, %v406_v55  ;;  %v705_v58 = vpop.f32.mrb[9].mxu0 }
 0x59d   :  { %v459_v59 = vpop.f32.mrb[10].mxu0 }
 0x59e   :  { %v464_v60 = vadd.f32 %v463_v43, %v457_v57  ;;  %v706_v61 = vpop.f32.mrb[11].mxu0 }
 0x5a0   :  { %v648_v62 = vmul.f32 -1.442695, %v464_v60 }
 0x5a2   :  { %746 = vpow2.f32 %v648_v62 }
 0x5ac   :  { %v747_v63 = vpop.eup %746 }
 0x5ad   :  { %v468_v1 = vadd.f32 1.0, %v747_v63 }
 0x5af   :  { %748 = vrcp.f32 %v468_v1 }
 0x5b9   :  { %v749_v2 = vpop.eup %748 }
 0x5ba   :  { %v475_v5 = vmul.f32 %v749_v2, %v473_v4  ;;  %v482_v16 = vsub.f32 1.0, %v749_v2 }
 0x5bc   :  { %477 = vrot.lane.b32.xlu1 %v475_v5, %s967_s0 }
 0x62e   :  { %v478_v6 = vpop.permute.xlu1 %477 }
 0x62f   :  { %v480_v7 = vadd.f32 %v478_v6, %v457_v57 }
 0x631   :  { %750 = vtanh.f32 %v480_v7 }
 0x63b   :  { %v751_v12 = vpop.eup %750 }
 0x63c   :  { %484 = vrot.lane.b32.xlu1 %v751_v12, %s979_s28 }
 0x640   :  { %493 = vrot.lane.b32.xlu1 %v492_v14, %s978_s24 }
 0x6ae   :  { %v485_v15 = vpop.permute.xlu1 %484 }
 0x6af   :  { %v487_v18 = vmul.f32 %v485_v15, %v482_v16 }
 0x6b2   :  { %v494_v17 = vpop.permute.xlu1 %493 }
 0x6b3   :  { %v496_v19 = vmul.f32 %v749_v2, %v494_v17 }
 0x6b5   :  { %v497_v20 = vadd.f32 %v496_v19, %v487_v18 }
 0x6b7   :  { %v498_v21 = vpack.c.bf16 %v497_v20, %v497_v20 }
 0x6b9   :  { %505 = vrot.lane.b32.xlu0 %v498_v21, %s979_s28 }
 0x72b   :  { %v506_v22 = vpop.permute.xlu0 %505 }
 0x72c   :  { %712 = vmatmul.mubr.msk.bf16.vlgmr.msra.gmra.mrb[8].mxu1 %vm145_vm1, %v506_v22 }
 0x7ff   :  { %v556_v0 = vpop.f32.mrb[8].mxu1 }
 0x800   :  { %v1225_v23 = vadd.f32 %v556_v0, %v503_v3  ;;  %v713_v24 = vpop.f32.mrb[9].mxu1 }
 0x801   :  { %v559_v25 = vpop.f32.mrb[10].mxu1 }
 0x802   :  { %v714_v26 = vpop.f32.mrb[11].mxu1  ;;  %v563_v27 = vsel %vm562_vm6, %v1225_v23, -inf }
 0x803   :  { %564 = vmax.xlane.f32.xlu1 %v563_v27 }
 0x814   :  { %578 = vrot.lane.b32.xlu1 %v1197_v40, %s979_s28 }
 0x890   :  { %v565_v28 = vpop.xlane.xlu1 %564 }
 0x891   :  { %v566_v29 = vsub.f32 %v1225_v23, %v565_v28 }
 0x893   :  { %v567_v30 = vmul.f32 1.442695, %v566_v29 }
 0x894   :  { %v579_v31 = vpop.permute.xlu1 %578 }
 0x895   :  { %752 = vpow2.f32 %v567_v30  ;;  %581 = vst.msk [vmem:[#allocation15] sm:$0x1] %vm339_vm4, %v579_v31 }
 0x89f   :  { %v753_v32 = vpop.eup %752 }
 0x8a0   :  { %v569_v33 = vsel %vm562_vm6, %v753_v32, 0.0 }
 0x8a1   :  { %570 = vadd.xlane.f32.xlu0 %v569_v33 }
 0x8b7   :  { %583 = vrot.lane.b32.xlu0 %v497_v20, %s979_s28 }
 0x8b8   :  { %899 = shalt.err (!%p896_p10)
}
 0x8b9   :  { %s900_s23 = scalar_lea.hbm %s1288_s15, 16 }
 0x8ba   :  { %p901_p11 = scmp.ne.s32.totalorder %s1288_s15, %s900_s23  ;;  %p904_p12 = scmp.lt.u32.totalorder %s900_s23, %s1288_s15 }
 0x8bc   :  { %p906_p13 = pnand %p904_p12, %p901_p11 }
 0x8be   :  { %909 = shalt.err (!%p906_p13)
}
 0x8bf   :  { %607 = dma.vmem_to_hbm [thread:$0]  %s605_s12, 16, %s1288_s15, [#allocation16]   ;;  %vm586_vm7 = vcmask 253952  }
 0x8c0   :  { %s981_s3 = smov [#allocation17]  }
 0x8c1   :  { %s614_s7 = sshll.u32 %s981_s3, 4  ;;  %s615_s7 = int_to_ptr.vmem [resolvable:$true] %s614_s7 }
 0x8c2   :  { %s910_s27 = scalar_lea.vmem %s615_s7, 16  ;;  %s914_s1 = scalar_lea.vmem %s615_s7, 32 }
 0x8c3   :  { %p911_p0 = scmp.ne.s32.totalorder %s615_s7, %s910_s27  ;;  %p915_p1 = scmp.lt.s32.totalorder %s615_s7, %s615_s7 }
 0x8c4   :  { %p916_p2 = scmp.lt.s32.totalorder %s914_s1, %s910_s27 }
 0x8c6   :  { %p917_p3 = por %p916_p2, %p915_p1 }
 0x8c8   :  { %p918_p4 = pnand %p917_p3, %p911_p0 }
 0x92e   :  { %v571_v34 = vpop.xlane.xlu0 %570 }
 0x92f   :  { %754 = vlog2.f32 %v571_v34 }
 0x932   :  { %v584_v35 = vpop.permute.xlu0 %583 }
 0x933   :  { %587 = vst.msk [vmem:[#allocation17] sm:$0x1] %vm586_vm7, %v584_v35 }
 0x934   :  { %921 = shalt.err (!%p918_p4)
}
 0x935   :  { %s922_s15 = scalar_lea.hbm %s1289_s16, 16 }
 0x936   :  { %p923_p5 = scmp.ne.s32.totalorder %s1289_s16, %s922_s15  ;;  %p926_p6 = scmp.lt.u32.totalorder %s922_s15, %s1289_s16 }
 0x938   :  { %p928_p7 = pnand %p926_p6, %p923_p5 }
 0x93a   :  { %931 = shalt.err (!%p928_p7)
}
 0x93b   :  { %617 = dma.vmem_to_hbm [thread:$0]  %s615_s7, 16, %s1289_s16, [#allocation16]   ;;  %v755_v36 = vpop.eup %754 }
 0x93c   :  { %v573_v37 = vmul.f32 0.6931472, %v755_v36  ;;  %s982_s18 = smov [#allocation14]  }
 0x93d   :  { %s594_s4 = sshll.u32 %s982_s18, 4  ;;  %s595_s4 = int_to_ptr.vmem [resolvable:$true] %s594_s4 }
 0x93e   :  { %v574_v38 = vadd.f32 %v573_v37, %v565_v28  ;;  %s932_s8 = scalar_lea.vmem %s595_s4, 16  ;;  %s936_s0 = scalar_lea.vmem %s595_s4, 32 }
 0x93f   :  { %p933_p8 = scmp.ne.s32.totalorder %s595_s4, %s932_s8  ;;  %p937_p9 = scmp.lt.s32.totalorder %s595_s4, %s595_s4 }
 0x940   :  { %v575_v39 = vsub.f32 %v1225_v23, %v574_v38  ;;  %p938_p10 = scmp.lt.s32.totalorder %s936_s0, %s932_s8 }
 0x942   :  { %576 = vst.msk [vmem:[#allocation14] sm:$0x1] %vm562_vm6, %v575_v39  ;;  %p939_p11 = por %p938_p10, %p937_p9 }
 0x944   :  { %p940_p12 = pnand %p939_p11, %p933_p8 }
 0x946   :  { %943 = shalt.err (!%p940_p12)
}
 0x947   :  { %s1294_s12 = sld [smem:[#allocation25_spill]] }
 0x94d   :  { %s944_s17 = scalar_lea.hbm %s1294_s12, 16 }
 0x94e   :  { %p945_p13 = scmp.ne.s32.totalorder %s1294_s12, %s944_s17  ;;  %p948_p0 = scmp.lt.u32.totalorder %s944_s17, %s1294_s12 }
 0x950   :  { %p950_p1 = pnand %p948_p0, %p945_p13 }
 0x952   :  { %953 = shalt.err (!%p950_p1)
}
 0x953   :  { %597 = dma.vmem_to_hbm [thread:$0]  %s595_s4, 16, %s1294_s12, [#allocation5]  }
 0x954   :  { %962 = dma.done.wait [#allocation5], 16  }
 0x955   :  { %963 = vsyncadd [#allocation5], 4294967280 }
 0x956   :  { %964 = dma.done.wait [#allocation16], 32  }
 0x957   :  { %965 = vsyncadd [#allocation16], 4294967264 }
 0x958   :  { %627 = vsyncpa [#allocation4], 1 }
 0x959   :  { %628 = vsyncpa [#allocation7], 1 }
 0x95a   :  { %629 = vsyncpa [#allocation10], 1 }
 0x95b   :  { %630 = vsyncpa [#allocation13], 1 }
 0x95c   :  { %631 = vsyncpa [#allocation5], 1 }
 0x95d   :  { %632 = vsyncpa [#allocation16], 1 }

</bundles_post_ra>
